<compile_context>
chip_gen: v6e
topology: v6e:2x2x1
jax: 0.10.0
libtpu: 0.0.40
codegen_flags: <defaults>
</compile_context>

<pallas_src>
import jax
import jax.numpy as jnp
from jax.experimental import pallas as pl
from jax.experimental.pallas import tpu as pltpu


def _round_up(x, m):
    return ((x + m - 1) // m) * m


def _pad_to(x, tail_shape):
    """Zero-pad the trailing dims of x up to tail_shape (no-op when aligned)."""
    lead = x.ndim - len(tail_shape)
    pads = [(0, 0)] * lead
    changed = False
    for cur, tgt in zip(x.shape[lead:], tail_shape):
        pads.append((0, tgt - cur))
        changed |= (tgt != cur)
    return jnp.pad(x, pads) if changed else x


def _vmem_plan():
    """(tile working-set budget, scoped vmem limit) in bytes, generation-aware.

    v7x has 64 MiB VMEM per TensorCore; v5e/v6e have 128 MiB.  Tile choices are
    made against `budget` (double-buffered blocks + scratch); the compiler gets
    `limit` with headroom on top.
    """
    cap = 64 * 1024 * 1024  # assume the most restrictive generation if unknown
    try:
        cap = int(getattr(pltpu.get_tpu_info(), "vmem_capacity_bytes", cap))
    except Exception:
        pass
    limit = min(cap * 3 // 4, 64 * 1024 * 1024)
    budget = max(8 * 1024 * 1024,
                 min(limit - 16 * 1024 * 1024, 32 * 1024 * 1024))
    return budget, limit


# ---------------------------------------------------------------------------
# Tile planning
# ---------------------------------------------------------------------------
def _plan_agg_tiles(n_pad, c2, in_bytes, out_bytes, budget):
    """Tiles for out(n, c2) = A(n, n) @ Y(n, c2) + bias(1, c2).

    Returns (tm, tn, tk); tk == n_pad means full-K (no k axis, no accumulator).
    Preference: output columns >= 256 (fill the 256-wide MXU on v6e/v7x), then
    rows >= 256, then area; when tiling K, shrink tk before tm/tn.
    """
    tm_c = [c for c in (512, 256, 128) if n_pad % c == 0] or [n_pad]
    tn_c = ([c2] if c2 <= 2048 else []) + \
           [c for c in (1024, 512, 256, 128) if c < c2 and c2 % c == 0]
    tn_c = list(dict.fromkeys(tn_c)) or [c2]

    best = None
    for tm in tm_c:
        for tn in tn_c:
            need = (2 * tm * n_pad + 2 * n_pad * tn) * in_bytes \
                   + 2 * tm * tn * out_bytes + 2 * tn * 4
            if need <= budget:
                key = (min(tn, 256), min(tm, 256), tm * tn)
                if best is None or key > best[0]:
                    best = (key, tm, tn)
    if best is not None:
        return best[1], best[2], n_pad

    tk_c = [c for c in (2048, 1024, 512, 256, 128) if n_pad % c == 0] or [n_pad]
    best = None
    for tm in tm_c:
        for tn in tn_c:
            for tk in tk_c:
                need = (2 * tm * tk + 2 * tk * tn) * in_bytes \
                       + 2 * tm * tn * out_bytes + tm * tn * 4 + 2 * tn * 4
                if need <= budget:
                    key = (min(tn, 256), min(tm, 256), tk, tm * tn)
                    if best is None or key > best[0]:
                        best = (key, tm, tn, tk)
    if best is not None:
        return best[1], best[2], best[3]
    return tm_c[-1], tn_c[-1], tk_c[-1]  # smallest config; last resort


def _plan_proj_tiles(n_rows, c_in, n_cols, in_bytes, out_bytes, budget):
    """Tiles for out(rows, n_cols) = X(rows, c_in) @ W(c_in, n_cols) + bias.

    Returns (tr, k_pad, tk).  tk == k_pad == c_in means the contraction stays
    unpadded/untiled; otherwise c_in is padded to k_pad (multiple of 128) and
    contracted in tk-sized steps with an f32 accumulator.
    """
    tr_c = [c for c in (512, 256, 128) if n_rows % c == 0] or [n_rows]
    for tr in tr_c:
        need = (2 * tr * c_in + 2 * c_in * n_cols) * in_bytes \
               + 2 * tr * n_cols * out_bytes + tr * n_cols * 4 + 2 * n_cols * 4
        if need <= budget:
            return tr, c_in, c_in
    k_pad = _round_up(c_in, 128)
    tk_c = [c for c in (1024, 512, 256, 128) if k_pad % c == 0] or [k_pad]
    for tr in tr_c:
        for tk in tk_c:
            need = (2 * tr * tk + 2 * tk * n_cols) * in_bytes \
                   + 2 * tr * n_cols * out_bytes + tr * n_cols * 4 + 2 * n_cols * 4
            if need <= budget:
                return tr, k_pad, tk
    return tr_c[-1], k_pad, tk_c[-1]


# ---------------------------------------------------------------------------
# Stage: batch-folded neighborhood aggregation on a 2-D slab
#   out(n, c2) = A(n, n) @ Y(n, c2) + bias(1, c2)
# ---------------------------------------------------------------------------
def _aggregate_slab(a, y, bias2, out_dtype, budget, vmem_limit):
    n_pad = a.shape[0]
    c2 = y.shape[1]
    in_bytes = jnp.dtype(a.dtype).itemsize
    out_bytes = jnp.dtype(out_dtype).itemsize
    tm, tn, tk = _plan_agg_tiles(n_pad, c2, in_bytes, out_bytes, budget)
    n_i, n_j = n_pad // tm, c2 // tn

    if tk == n_pad:
        # Full-K: direct dot per output tile, no accumulator scratch.  The grid
        # order is chosen so the larger-traffic operand keeps a constant block
        # index along the inner axis and is therefore fetched from HBM once.
        t_row_outer = n_pad * n_pad + n_i * n_pad * c2
        t_col_outer = n_j * n_pad * n_pad + n_pad * c2
        if t_row_outer <= t_col_outer:
            grid = (n_i, n_j)
            a_map = lambda i, j: (i, 0)
            y_map = lambda i, j: (0, j)
            b_map = lambda i, j: (0, j)
            o_map = lambda i, j: (i, j)
        else:
            grid = (n_j, n_i)
            a_map = lambda j, i: (i, 0)
            y_map = lambda j, i: (0, j)
            b_map = lambda j, i: (0, j)
            o_map = lambda j, i: (i, j)

        def kernel(a_ref, y_ref, b_ref, o_ref):
            o_ref[...] = (jnp.dot(a_ref[...], y_ref[...],
                                  preferred_element_type=jnp.float32)
                          + b_ref[...]).astype(o_ref.dtype)

        return pl.pallas_call(
            kernel,
            out_shape=jax.ShapeDtypeStruct((n_pad, c2), out_dtype),
            grid_spec=pltpu.PrefetchScalarGridSpec(
                num_scalar_prefetch=0,
                grid=grid,
                in_specs=[pl.BlockSpec((tm, n_pad), a_map),
                          pl.BlockSpec((n_pad, tn), y_map),
                          pl.BlockSpec((1, tn), b_map)],
                out_specs=pl.BlockSpec((tm, tn), o_map)),
            compiler_params=pltpu.CompilerParams(
                dimension_semantics=("parallel", "parallel"),
                vmem_limit_bytes=vmem_limit),
        )(a, y, bias2)

    # K-tiled fallback for large graphs: f32 accumulator, bias on the last step.
    def kernel(a_ref, y_ref, b_ref, o_ref, acc_ref):
        @pl.when(pl.program_id(2) == 0)
        def _():
            acc_ref[...] = jnp.zeros_like(acc_ref)

        acc_ref[...] += jnp.dot(a_ref[...], y_ref[...],
                                preferred_element_type=jnp.float32)

        @pl.when(pl.program_id(2) == pl.num_programs(2) - 1)
        def _():
            o_ref[...] = (acc_ref[...] + b_ref[...]).astype(o_ref.dtype)

    return pl.pallas_call(
        kernel,
        out_shape=jax.ShapeDtypeStruct((n_pad, c2), out_dtype),
        grid_spec=pltpu.PrefetchScalarGridSpec(
            num_scalar_prefetch=0,
            grid=(n_i, n_j, n_pad // tk),
            in_specs=[pl.BlockSpec((tm, tk), lambda i, j, k: (i, k)),
                      pl.BlockSpec((tk, tn), lambda i, j, k: (k, j)),
                      pl.BlockSpec((1, tn), lambda i, j, k: (0, j))],
            out_specs=pl.BlockSpec((tm, tn), lambda i, j, k: (i, j)),
            scratch_shapes=[pltpu.VMEM((tm, tn), jnp.float32)]),
        compiler_params=pltpu.CompilerParams(
            dimension_semantics=("parallel", "parallel", "arbitrary"),
            vmem_limit_bytes=vmem_limit),
    )(a, y, bias2)


# ---------------------------------------------------------------------------
# Stage: feature projection, native (B, N, C_in) -> slab (N, B*co_pad)
#   Y2[:, b*co:(b+1)*co] = X[b] @ W + bias        (bias may be zeros)
# ---------------------------------------------------------------------------
def _project_native_to_slab(x, w, bias, out_dtype, compute_dtype, tr, tk,
                            vmem_limit):
    b_sz, n_rows, k_pad = x.shape
    co = w.shape[1]                       # per-batch column stride (mult of 128)
    n_i, n_k = n_rows // tr, k_pad // tk

    def kernel(x_ref, w_ref, b_ref, o_ref, acc_ref):
        @pl.when(pl.program_id(2) == 0)
        def _():
            acc_ref[...] = jnp.zeros_like(acc_ref)

        # Single-use operand: cast to the MXU compute dtype in-kernel (VPU op
        # hidden under the MXU), avoiding an extra HBM round trip in the wrapper.
        acc_ref[...] += jnp.dot(x_ref[0].astype(compute_dtype), w_ref[...],
                                preferred_element_type=jnp.float32)

        @pl.when(pl.program_id(2) == pl.num_programs(2) - 1)
        def _():
            o_ref[...] = (acc_ref[...] + b_ref[...]).astype(o_ref.dtype)

    return pl.pallas_call(
        kernel,
        out_shape=jax.ShapeDtypeStruct((n_rows, b_sz * co), out_dtype),
        grid_spec=pltpu.PrefetchScalarGridSpec(
            num_scalar_prefetch=0,
            grid=(b_sz, n_i, n_k),
            in_specs=[pl.BlockSpec((1, tr, tk), lambda b, i, k: (b, i, k)),
                      pl.BlockSpec((tk, co), lambda b, i, k: (k, 0)),
                      pl.BlockSpec((1, co), lambda b, i, k: (0, 0))],
            # Batch-fold: batch index selects the output column strip.
            out_specs=pl.BlockSpec((tr, co), lambda b, i, k: (i, b)),
            scratch_shapes=[pltpu.VMEM((tr, co), jnp.float32)]),
        compiler_params=pltpu.CompilerParams(
            dimension_semantics=("parallel", "parallel", "arbitrary"),
            vmem_limit_bytes=vmem_limit),
    )(x, w, bias)


# ---------------------------------------------------------------------------
# Stage: feature projection, slab (N, B*ci_pad) -> native (B, N, C_out)
#   out[b] = Z2[:, b*ci:(b+1)*ci] @ W + bias
# ---------------------------------------------------------------------------
def _project_slab_to_native(z, w, bias, out_dtype, b_sz, tr, tk, vmem_limit):
    n_rows, c2 = z.shape
    ci_pad = c2 // b_sz
    co = w.shape[1]
    n_i = n_rows // tr
    k_per_batch = ci_pad // tk

    def kernel(z_ref, w_ref, b_ref, o_ref, acc_ref):
        @pl.when(pl.program_id(2) == 0)
        def _():
            acc_ref[...] = jnp.zeros_like(acc_ref)

        acc_ref[...] += jnp.dot(z_ref[...], w_ref[...],
                                preferred_element_type=jnp.float32)

        @pl.when(pl.program_id(2) == pl.num_programs(2) - 1)
        def _():
            o_ref[0] = (acc_ref[...] + b_ref[...]).astype(o_ref.dtype)

    return pl.pallas_call(
        kernel,
        out_shape=jax.ShapeDtypeStruct((b_sz, n_rows, co), out_dtype),
        grid_spec=pltpu.PrefetchScalarGridSpec(
            num_scalar_prefetch=0,
            grid=(b_sz, n_i, k_per_batch),
            in_specs=[pl.BlockSpec((tr, tk),
                                   lambda b, i, k: (i, b * k_per_batch + k)),
                      pl.BlockSpec((tk, co), lambda b, i, k: (k, 0)),
                      pl.BlockSpec((1, co), lambda b, i, k: (0, 0))],
            out_specs=pl.BlockSpec((1, tr, co), lambda b, i, k: (b, i, 0)),
            scratch_shapes=[pltpu.VMEM((tr, co), jnp.float32)]),
        compiler_params=pltpu.CompilerParams(
            dimension_semantics=("parallel", "parallel", "arbitrary"),
            vmem_limit_bytes=vmem_limit),
    )(z, w, bias)


# ---------------------------------------------------------------------------
# GCNUnit forward
# ---------------------------------------------------------------------------
def gcn_unit_forward(X, A, W, bias=None, *, compute_dtype=None):
    """Dense-GCN forward: out[b] = A @ X[b] @ W + bias -> (B, N, C_out).

    compute_dtype=jnp.bfloat16 feeds bf16 MXU operands (f32 accumulation);
    default keeps the input dtype (f32) for bit-accurate checking.
    """
    B, N, C_in = X.shape
    C_out = W.shape[1]
    out_dtype = X.dtype
    cdt = jnp.dtype(compute_dtype) if compute_dtype is not None else jnp.dtype(X.dtype)
    in_bytes = cdt.itemsize
    if bias is None:
        bias = jnp.zeros((1, C_out), jnp.float32)

    budget, vmem_limit = _vmem_plan()

    # Node padding: only sublane-aligned for small graphs; 128-aligned when the
    # aggregation / projection may be tiled at 128 granularity.  Channel dims are
    # padded only where they form a slab column strip (must be a multiple of 128)
    # or a tiled contraction; everything else stays as full-dim blocks.
    n_pad = _round_up(N, 128) if N > 128 else _round_up(N, 16)
    a_p = _pad_to(A, (n_pad, n_pad)).astype(cdt)  # reused across the whole grid

    if C_out <= C_in:
        # ---- project first: the narrower width rides through the O(N^2) stage ----
        co_pad = _round_up(C_out, 128)            # slab column-strip stride
        tr, k_pad, tk = _plan_proj_tiles(n_pad, C_in, co_pad, in_bytes,
                                         cdt.itemsize, budget)
        x_p = _pad_to(X, (n_pad, k_pad))          # cast happens in-kernel (single use)
        w_p = _pad_to(W, (k_pad, co_pad)).astype(cdt)
        zero_b = jnp.zeros((1, co_pad), jnp.float32)
        y_slab = _project_native_to_slab(x_p, w_p, zero_b, cdt, cdt, tr, tk,
                                         vmem_limit)
        bias_slab = jnp.tile(_pad_to(bias.astype(jnp.float32), (1, co_pad)), (1, B))
        out_slab = _aggregate_slab(a_p, y_slab, bias_slab, out_dtype, budget,
                                   vmem_limit)
        # Single wrapper relayout pass (on the narrower C_out side).
        out = out_slab.reshape(n_pad, B, co_pad).transpose(1, 0, 2)
        return out[:, :N, :C_out]

    # ---- aggregate first (C_out > C_in): A@X at the narrower input width ----
    ci_pad = _round_up(C_in, 128)                 # slab column-strip stride
    # Fold batch into slab columns once in the wrapper (fused with pad + cast);
    # the slab is re-read across row strips, so casting here halves its traffic.
    x_slab = (_pad_to(X, (n_pad, ci_pad)).astype(cdt)
              .transpose(1, 0, 2).reshape(n_pad, B * ci_pad))
    zero_b = jnp.zeros((1, B * ci_pad), jnp.float32)
    z_slab = _aggregate_slab(a_p, x_slab, zero_b, cdt, budget, vmem_limit)
    tr, _, tk = _plan_proj_tiles(n_pad, ci_pad, C_out, in_bytes,
                                 jnp.dtype(out_dtype).itemsize, budget)
    w_p = _pad_to(W, (ci_pad, C_out)).astype(cdt)
    out_p = _project_slab_to_native(z_slab, w_p, bias.astype(jnp.float32),
                                    out_dtype, B, tr, tk, vmem_limit)
    return out_p[:, :N, :]


def reference_forward(X, A, W, bias):
    return jnp.einsum("nm,bmc->bnc", A, X) @ W + bias[None, :, :]


# TODO(synk): PyG sparse-adjacency variants (cluster/sample partitioning, GAT/
# Cheb/SAGE/EGNN cells) need sparse gather/scatter message passing and are not
# implemented; this covers the dense-adjacency 'ours'/'normal' GCNConv path only.


if __name__ == "__main__":
    key = jax.random.PRNGKey(0)
    k_a, k_x1, k_w1, k_b1, k_x2, k_w2, k_b2 = jax.random.split(key, 7)

    B, N = 2, 16

    # Dense adjacency: random undirected graph + self loops, row-normalized.
    raw = (jax.random.uniform(k_a, (N, N)) > 0.7).astype(jnp.float32)
    adj = jnp.maximum(raw, raw.T) + jnp.eye(N, dtype=jnp.float32)
    A = adj / jnp.sum(adj, axis=1, keepdims=True)

    def make_params(kx, kw, kb, c_in, c_out):
        x = jax.random.normal(kx, (B, N, c_in), dtype=jnp.float32)
        scale = (6.0 / (c_in + c_out)) ** 0.5
        w = jax.random.uniform(kw, (c_in, c_out), minval=-scale, maxval=scale,
                               dtype=jnp.float32)
        b = jax.random.uniform(kb, (1, c_out), minval=-0.1, maxval=0.1,
                               dtype=jnp.float32)
        return x, w, b

    # Case 1: C_out > C_in -> aggregate-first path (batch-folded A@X slab, then X@W+bias).
    X1, W1, b1 = make_params(k_x1, k_w1, k_b1, 4, 8)
    out1 = jax.block_until_ready(gcn_unit_forward(X1, A, W1, b1))
    ref1 = reference_forward(X1, A, W1, b1)
    assert out1.shape == (B, N, 8)
    assert jnp.allclose(out1, ref1, atol=1e-4, rtol=1e-4)

    # Case 2: C_out < C_in -> project-first path (X@W into slab, then one A@Y2+bias matmul).
    X2, W2, b2 = make_params(k_x2, k_w2, k_b2, 8, 4)
    out2 = jax.block_until_ready(gcn_unit_forward(X2, A, W2, b2))
    ref2 = reference_forward(X2, A, W2, b2)
    assert out2.shape == (B, N, 4)
    assert jnp.allclose(out2, ref2, atol=1e-4, rtol=1e-4)

    # bf16 MXU path (recommended on v6e/v7x): bf16 operands, f32 accumulation, f32 output.
    out1_bf16 = jax.block_until_ready(
        gcn_unit_forward(X1, A, W1, b1, compute_dtype=jnp.bfloat16))
    assert out1_bf16.shape == (B, N, 8)
    assert jnp.allclose(out1_bf16, ref1, atol=5e-2, rtol=5e-2)

    print("KERNEL_OK")
</pallas_src>

<mosaic_0001>
module attributes {stable_mosaic.version = 11 : i64} {
  func.func @kernel(%arg0: i32, %arg1: i32, %arg2: memref<16x16xf32, #tpu.memory_space<vmem>>, %arg3: memref<16x256xf32, #tpu.memory_space<vmem>>, %arg4: memref<1x256xf32, #tpu.memory_space<vmem>>, %arg5: memref<16x256xf32, #tpu.memory_space<vmem>>) attributes {dimension_semantics = [#tpu.dimension_semantics<parallel>, #tpu.dimension_semantics<parallel>], iteration_bounds = array<i64: 1, 1>, scalar_prefetch = 0 : i64, scratch_operands = 0 : i64, tpu.core_type = #tpu.core_type<tc>, window_params = [{transform_indices = @transform_0, window_bounds = array<i64: 16, 16>}, {transform_indices = @transform_1, window_bounds = array<i64: 16, 256>}, {transform_indices = @transform_2, window_bounds = array<i64: 1, 256>}, {transform_indices = @transform_3, window_bounds = array<i64: 16, 256>}]} {
    %c0 = arith.constant 0 : index
    %c0_0 = arith.constant 0 : index
    %0 = vector.load %arg2[%c0, %c0_0] : memref<16x16xf32, #tpu.memory_space<vmem>>, vector<16x16xf32>
    %c0_1 = arith.constant 0 : index
    %c0_2 = arith.constant 0 : index
    %1 = vector.load %arg3[%c0_1, %c0_2] : memref<16x256xf32, #tpu.memory_space<vmem>>, vector<16x256xf32>
    %cst = arith.constant dense<0.000000e+00> : vector<16x256xf32>
    %2 = tpu.matmul %0, %1, %cst {dimension_numbers = #tpu.dot_dimension_numbers<[1], [0], [0], [1], [0, 0, 1, 1], [], []>} : vector<16x16xf32>, vector<16x256xf32>, vector<16x256xf32> -> vector<16x256xf32>
    %c0_3 = arith.constant 0 : index
    %c0_4 = arith.constant 0 : index
    %3 = vector.load %arg4[%c0_3, %c0_4] : memref<1x256xf32, #tpu.memory_space<vmem>>, vector<1x256xf32>
    %4 = vector.broadcast %3 : vector<1x256xf32> to vector<16x256xf32>
    %5 = arith.addf %2, %4 : vector<16x256xf32>
    %c0_5 = arith.constant 0 : index
    %c0_6 = arith.constant 0 : index
    %6 = vector.load %arg5[%c0_5, %c0_6] : memref<16x256xf32, #tpu.memory_space<vmem>>, vector<16x256xf32>
    tpu.vector_store %arg5[%c0_5, %c0_6], %5 {strides = array<i32>} : memref<16x256xf32, #tpu.memory_space<vmem>>, vector<16x256xf32>,
    return
  }
  func.func @transform_0(%arg0: i32, %arg1: i32) -> (i32, i32) {
    %c0_i32 = arith.constant 0 : i32
    %c0_i32_0 = arith.constant 0 : i32
    return %arg0, %c0_i32 : i32, i32
  }
  func.func @transform_1(%arg0: i32, %arg1: i32) -> (i32, i32) {
    %c0_i32 = arith.constant 0 : i32
    %c0_i32_0 = arith.constant 0 : i32
    return %c0_i32, %arg1 : i32, i32
  }
  func.func @transform_2(%arg0: i32, %arg1: i32) -> (i32, i32) {
    %c0_i32 = arith.constant 0 : i32
    %c0_i32_0 = arith.constant 0 : i32
    return %c0_i32, %arg1 : i32, i32
  }
  func.func @transform_3(%arg0: i32, %arg1: i32) -> (i32, i32) {
    %c0_i32 = arith.constant 0 : i32
    return %arg0, %arg1 : i32, i32
  }
}

</mosaic_0001>

<bundles_post_ra>
// kernel: tpu_custom_call.1
= control target key start
LH: loop header
LB: loop body
LE: loop exit
PB: predicated region body
PF: predicated region fallthrough
CT: control target
= control target key end

     0   :  { %8 = vsyncpa [#allocation3], 0  ;;  %s293_s0 = inlined_call_operand.hbm [shape: f32[16,16], index: 0, kind: input, shape index: {}]   ;;  %s294_s1 = inlined_call_operand.hbm [shape: f32[16,256], index: 1, kind: input, shape index: {}]   ;;  %s295_s2 = inlined_call_operand.vmem [shape: f32[1,256], index: 2, kind: input, shape index: {}]   ;;  %s296_s3 = inlined_call_operand.hbm [shape: f32[16,256], index: 3, kind: output, shape index: {}]  }
   0x1   :  { %9 = vsyncpa [#allocation6], 0 }
   0x2   :  { %10 = vsyncpa [#allocation4], 0  ;;  %s247_s12 = smov [#allocation2]  }
   0x3   :  { %s16_s13 = sshll.u32 %s247_s12, 4  ;;  %s17_s13 = int_to_ptr.vmem [resolvable:$true] %s16_s13 }
   0x4   :  { %s189_s14 = scalar_lea.vmem %s17_s13, 256  ;;  %p194_p1 = scmp.lt.s32.totalorder %s17_s13, %s17_s13 }
   0x5   :  { %p190_p0 = scmp.ne.s32.totalorder %s17_s13, %s189_s14  ;;  %p195_p2 = scmp.lt.s32.totalorder %s189_s14, %s189_s14 }
   0x7   :  { %p196_p3 = por %p195_p2, %p194_p1 }
   0x9   :  { %p197_p4 = pnand %p196_p3, %p190_p0 }
   0xb   :  { %200 = shalt.err (!%p197_p4)
}
   0xc   :  { %s248_s15 = smov 128   ;;  %s249_s16 = smov 8  }
   0xd   :  { %22 = dma.hbm_to_vmem [thread:$0]  %s293_s0, 256, %s17_s13, [#allocation3], %s248_s15, %s248_s15, %s249_s16  }
   0xe   :  { %s250_s19 = smov [#allocation5]  }
   0xf   :  { %s28_s20 = sshll.u32 %s250_s19, 4  ;;  %s29_s20 = int_to_ptr.vmem [resolvable:$true] %s28_s20 }
  0x10   :  { %s209_s21 = scalar_lea.vmem %s29_s20, 512  ;;  %p214_p6 = scmp.lt.s32.totalorder %s29_s20, %s29_s20 }
  0x11   :  { %p210_p5 = scmp.ne.s32.totalorder %s29_s20, %s209_s21  ;;  %p215_p7 = scmp.lt.s32.totalorder %s209_s21, %s209_s21 }
  0x13   :  { %p216_p8 = por %p215_p7, %p214_p6 }
  0x15   :  { %p217_p9 = pnand %p216_p8, %p210_p5 }
  0x17   :  { %220 = shalt.err (!%p217_p9)
}
  0x18   :  { %s251_s22 = smov 256   ;;  %s252_s23 = smov 16  }
  0x19   :  { %34 = dma.hbm_to_vmem [thread:$0]  %s294_s1, 512, %s29_s20, [#allocation6], %s251_s22, %s251_s22, %s252_s23  }
  0x1a   :  { %241 = dma.done.wait [#allocation3], 256  }
  0x1b   :  { %242 = vsyncadd [#allocation3], 4294967040 }
  0x1c   :  { %243 = dma.done.wait [#allocation6], 512  }
  0x1d   :  { %244 = vsyncadd [#allocation6], 4294966784  ;;  %v253_v0 = vmov 0.0   ;;  %v48_v1 = vld [vmem:[#allocation5 + $0x18] sm:$0xff]  ;;  %v47_v2 = vld [vmem:[#allocation5 + $0x10] sm:$0xff]  ;;  %vm61_vm0 = vcmask 130048   ;;  %v51_v7 = vlaneseq }
  0x1e   :  { %132 = vmatprep.mubr.f32.mxu0 %v253_v0  ;;  %138 = vmatprep.mubr.f32.mxu1 %v253_v0  ;;  %v46_v3 = vld [vmem:[#allocation5 + $0x8] sm:$0xff]  ;;  %v45_v4 = vld [vmem:[#allocation5] sm:$0xff]  ;;  %v43_v5 = vld [vmem:[#allocation2] sm:$0xff]  ;;  %s254_s26 = smov [#allocation7]  }
  0x1f   :  { %96 = vmatprep.subr.mxu0 %v48_v1  ;;  %169 = vmatprep.subr.mxu1 %v48_v1  ;;  %v44_v6 = vld [vmem:[#allocation2 + $0x8] sm:$0xff]  ;;  %v52_v8 = vshrl.u32 %v51_v7, 7  ;;  %v49_v10 = vld [vmem:[%s295_s2] sm:$0x3]  ;;  %s154_s27 = sshll.u32 %s254_s26, 4  ;;  %s155_s27 = int_to_ptr.vmem [resolvable:$true] %s154_s27 }
  0x20   :  { %97 = vmatpush1.msra.mxu0 %v47_v2  ;;  %171 = vmatpush1.msra.mxu1 %v47_v2  ;;  %s221_s28 = scalar_lea.vmem %s155_s27, 512  ;;  %p226_p11 = scmp.lt.s32.totalorder %s155_s27, %s155_s27 }
  0x21   :  { %98 = vmatprep.subr.mxu0 %v46_v3  ;;  %170 = vmatprep.subr.mxu1 %v46_v3  ;;  %v53_v9 = vsub.s32 0, %v52_v8  ;;  %v57_v11 = vsub.s32 1, %v52_v8  ;;  %p222_p10 = scmp.ne.s32.totalorder %s155_s27, %s221_s28  ;;  %p227_p12 = scmp.lt.s32.totalorder %s221_s28, %s221_s28 }
  0x22   :  { %99 = vmatpush1.msra.mxu0 %v45_v4  ;;  %172 = vmatpush1.msra.mxu1 %v45_v4 }
  0x23   :  { %167 = vmatmul.mubr.msk.f32.vlgmr.msra.gmra.mxu0 %vm61_vm0, %v43_v5  ;;  %168 = vmatmul.mubr.msk.f32.vlgmr.msra.gmra.mxu1 %vm61_vm0, %v44_v6  ;;  %v54_v12 = vrot.slane %v49_v10, %v53_v9  ;;  %v58_v13 = vrot.slane %v49_v10, %v57_v11  ;;  %p228_p13 = por %p227_p12, %p226_p11 }
  0x25   :  { %p229_p0 = pnand %p228_p13, %p222_p10 }
  0xe3   :  { %v134_v14 = vpop.f32.mrf.mxu0  ;;  %v140_v15 = vpop.f32.mrf.mxu1 }
  0xe4   :  { %v135_v16 = vadd.f32 %v134_v14, %v54_v12  ;;  %v141_v17 = vadd.f32 %v140_v15, %v54_v12 }
  0xe5   :  { %v136_v18 = vpop.f32.mrf.mxu0  ;;  %v142_v19 = vpop.f32.mrf.mxu1 }
  0xe6   :  { %145 = vst [vmem:[#allocation7] sm:$0xff] %v135_v16  ;;  %147 = vst [vmem:[#allocation7 + $0x10] sm:$0xff] %v141_v17  ;;  %v137_v20 = vadd.f32 %v136_v18, %v58_v13  ;;  %v143_v21 = vadd.f32 %v142_v19, %v58_v13 }
  0xe8   :  { %146 = vst [vmem:[#allocation7 + $0x8] sm:$0xff] %v137_v20  ;;  %148 = vst [vmem:[#allocation7 + $0x18] sm:$0xff] %v143_v21 }
  0xe9   :  { %232 = shalt.err (!%p229_p0)
}
  0xea   :  { %160 = dma.vmem_to_hbm [thread:$0]  %s155_s27, 512, %s296_s3, [#allocation4], %s251_s22, %s251_s22, %s252_s23  }
  0xeb   :  { %245 = dma.done.wait [#allocation4], 512  }
  0xec   :  { %246 = vsyncadd [#allocation4], 4294966784 }
  0xed   :  { %164 = vsyncpa [#allocation3], 1 }
  0xee   :  { %165 = vsyncpa [#allocation6], 1 }
  0xef   :  { %166 = vsyncpa [#allocation4], 1 }

</bundles_post_ra>
